<compile_context>
chip_gen: v7x
topology: tpu7x:2x2x1
jax: 0.10.0
libtpu: 0.0.40
codegen_flags: <defaults>
</compile_context>

<pallas_src>
import jax
import jax.numpy as jnp
from jax.experimental import pallas as pl
from jax.experimental.pallas import tpu as pltpu

KH = KW = 3  # 3x3 conv, padding=1, stride=1


def conv_folded_kernel(x_ref, t_ref, b_ref, o_ref):
    """One batch-block per grid step; a single MXU matmul + bias + ReLU.

    x_ref : (M_BLK, K_pad)  im2row'd input (kh, W, Cin folded; K zero-padded), bf16
    t_ref : (K_pad, N)      banded conv weight (Toeplitz over W), bf16
    b_ref : (1, N)          bias tiled over W, f32
    o_ref : (M_BLK, N)      lane-dense output; rows are (b, h) pairs
    """
    acc = jnp.dot(x_ref[...], t_ref[...], preferred_element_type=jnp.float32)
    o_ref[...] = jnp.maximum(acc + b_ref[...], 0.0).astype(o_ref.dtype)


def _build_toeplitz_weight(w_hwio, W):
    """(KH,KW,Cin,Cout) -> (KH, W*Cin, W*Cout) banded matrix.

    T[kh, w_in*Cin + ci, w*Cout + co] = w[kh, kw, ci, co] iff w_in == w+kw-pad,
    zero otherwise (this encodes the W-direction zero padding for free).
    """
    kh, kw_n, cin, cout = w_hwio.shape
    pad_w = (kw_n - 1) // 2
    t5 = jnp.zeros((kh, W, cin, W, cout), dtype=w_hwio.dtype)
    for kw in range(kw_n):
        sel = jax.nn.one_hot(jnp.arange(W) + kw - pad_w, W,
                             dtype=w_hwio.dtype)            # (W_out, W_in)
        t5 = t5 + jnp.einsum('wp,kio->kpiwo', sel, w_hwio[:, kw])
    return t5.reshape(kh, W * cin, W * cout)


def backbone_forward(x_nchw, w_hwio, bias):
    """x_nchw: (B, Cin, H, W) f32 -> (B, Cout, H, W) f32 (Conv3x3 pad=1 + ReLU)."""
    B, Cin, H, W = x_nchw.shape
    kh_n, kw_n, _, Cout = w_hwio.shape
    pad_h = (kh_n - 1) // 2

    N = W * Cout                          # output lane width  (512 here)
    K = kh_n * W * Cin                    # folded contraction (192 here)
    K_pad = ((K + 127) // 128) * 128      # pad to MXU-friendly 256

    # --- single producer pass: NCHW -> im2row (B*H, K_pad), bf16 ----------
    # TODO(synk): if this block feeds another packed-layout layer, keep the
    # activations in this (B*H, W*C) layout and drop the NCHW<->packed passes.
    x_nhwc = jnp.transpose(x_nchw, (0, 2, 3, 1))                   # (B,H,W,Cin)
    xp = jnp.pad(x_nhwc, ((0, 0), (pad_h, pad_h), (0, 0), (0, 0)))  # H halo only
    xk = jnp.stack([xp[:, kh:kh + H] for kh in range(kh_n)], axis=2)
    xk = xk.reshape(B, H, K)
    xk = jnp.pad(xk, ((0, 0), (0, 0), (0, K_pad - K)))
    xk = xk.reshape(B * H, K_pad).astype(jnp.bfloat16)

    # --- weight / bias prep (tiny, one-time) -------------------------------
    # TODO(synk): O(W^2) band build; hoist/precompute outside the forward when
    # weights are static, and W/N-tile it for large W (v7x 64 MiB VMEM).
    T = _build_toeplitz_weight(w_hwio, W).reshape(K, N)
    T = jnp.pad(T, ((0, K_pad - K), (0, 0))).astype(jnp.bfloat16)
    bias_flat = jnp.tile(bias, W).reshape(1, N).astype(jnp.float32)

    # --- grid: >= 2 parallel steps so v7x's second TC has work -------------
    B_BLK = B // 2 if (B >= 2 and B % 2 == 0) else 1
    assert B % B_BLK == 0, "B must be divisible by the batch block"
    M_BLK = B_BLK * H
    assert M_BLK % 8 == 0 and N % 128 == 0 and K_pad % 128 == 0
    grid = (B // B_BLK,)

    def run(single_buffer_weights):
        wkw = dict(pipeline_mode=pl.Buffered(1)) if single_buffer_weights else {}
        return pl.pallas_call(
            conv_folded_kernel,
            out_shape=jax.ShapeDtypeStruct((B * H, N), x_nchw.dtype),
            grid_spec=pltpu.PrefetchScalarGridSpec(
                num_scalar_prefetch=0,
                grid=grid,
                in_specs=[
                    pl.BlockSpec((M_BLK, K_pad), lambda b: (b, 0)),
                    pl.BlockSpec((K_pad, N), lambda b: (0, 0), **wkw),
                    pl.BlockSpec((1, N), lambda b: (0, 0), **wkw),
                ],
                out_specs=pl.BlockSpec((M_BLK, N), lambda b: (b, 0)),
            ),
            compiler_params=pltpu.CompilerParams(
                dimension_semantics=("parallel",),
                vmem_limit_bytes=32 * 1024 * 1024),
        )(xk, T, bias_flat)

    try:
        out2d = run(True)    # single-buffer the grid-invariant weight/bias
    except Exception:
        out2d = run(False)   # fallback: default double buffering

    # --- back to the PyTorch NCHW convention --------------------------------
    out = out2d.reshape(B, H, W, Cout)
    return jnp.transpose(out, (0, 3, 1, 2))


if __name__ == "__main__":
    # Small deterministic problem: batch=2, Cin=4, H=W=16, Cout=32.
    B, Cin, H, W, Cout = 2, 4, 16, 16, 32

    key = jax.random.PRNGKey(0)
    kx, kw, kb = jax.random.split(key, 3)
    x = jax.random.normal(kx, (B, Cin, H, W), dtype=jnp.float32)
    # Deterministic "init": HWIO weights + bias (synthetic, not a checkpoint).
    w_hwio = jax.random.normal(kw, (KH, KW, Cin, Cout), dtype=jnp.float32) * 0.1
    bias = jax.random.normal(kb, (Cout,), dtype=jnp.float32) * 0.1

    out = jax.block_until_ready(backbone_forward(x, w_hwio, bias))

    # Reference uses the same bf16-rounded operands as the kernel's
    # bf16 x bf16 -> f32 matmul, so the comparison stays tight.
    x_r = x.astype(jnp.bfloat16).astype(jnp.float32)
    w_r = w_hwio.astype(jnp.bfloat16).astype(jnp.float32)
    ref = jax.lax.conv_general_dilated(
        x_r, w_r, window_strides=(1, 1), padding="SAME",
        dimension_numbers=("NCHW", "HWIO", "NCHW"))
    ref = jnp.maximum(ref + bias[None, :, None, None], 0.0)

    assert out.shape == (B, Cout, H, W)
    assert jnp.allclose(out, ref, atol=1e-3, rtol=1e-3)

    print("KERNEL_OK")
</pallas_src>

<mosaic_0001>
module attributes {stable_mosaic.version = 11 : i64} {
  func.func @conv_folded_kernel(%arg0: i32, %arg1: memref<16x256xbf16, #tpu.memory_space<vmem>>, %arg2: memref<256x512xbf16, #tpu.memory_space<vmem>>, %arg3: memref<1x512xf32, #tpu.memory_space<vmem>>, %arg4: memref<16x512xf32, #tpu.memory_space<vmem>>) attributes {dimension_semantics = [#tpu.dimension_semantics<parallel>], iteration_bounds = array<i64: 2>, scalar_prefetch = 0 : i64, scratch_operands = 0 : i64, tpu.core_type = #tpu.core_type<tc>, window_params = [{transform_indices = @transform_0, window_bounds = array<i64: 16, 256>}, {pipeline_mode = #tpu.pipeline_mode<synchronous>, transform_indices = @transform_1, window_bounds = array<i64: 256, 512>}, {pipeline_mode = #tpu.pipeline_mode<synchronous>, transform_indices = @transform_2, window_bounds = array<i64: 1, 512>}, {transform_indices = @transform_3, window_bounds = array<i64: 16, 512>}]} {
    %c0 = arith.constant 0 : index
    %c0_0 = arith.constant 0 : index
    %0 = vector.load %arg1[%c0, %c0_0] : memref<16x256xbf16, #tpu.memory_space<vmem>>, vector<16x256xbf16>
    %c0_1 = arith.constant 0 : index
    %c0_2 = arith.constant 0 : index
    %1 = vector.load %arg2[%c0_1, %c0_2] : memref<256x512xbf16, #tpu.memory_space<vmem>>, vector<256x512xbf16>
    %cst = arith.constant dense<0.000000e+00> : vector<16x512xf32>
    %2 = tpu.matmul %0, %1, %cst {dimension_numbers = #tpu.dot_dimension_numbers<[1], [0], [0], [1], [0, 0, 1, 1], [], []>} : vector<16x256xbf16>, vector<256x512xbf16>, vector<16x512xf32> -> vector<16x512xf32>
    %c0_3 = arith.constant 0 : index
    %c0_4 = arith.constant 0 : index
    %3 = vector.load %arg3[%c0_3, %c0_4] : memref<1x512xf32, #tpu.memory_space<vmem>>, vector<1x512xf32>
    %4 = vector.broadcast %3 : vector<1x512xf32> to vector<16x512xf32>
    %5 = arith.addf %2, %4 : vector<16x512xf32>
    %cst_5 = arith.constant 0.000000e+00 : f32
    %6 = vector.broadcast %cst_5 : f32 to vector<16x512xf32>
    %7 = arith.maximumf %5, %6 : vector<16x512xf32>
    %c0_6 = arith.constant 0 : index
    %c0_7 = arith.constant 0 : index
    %8 = vector.load %arg4[%c0_6, %c0_7] : memref<16x512xf32, #tpu.memory_space<vmem>>, vector<16x512xf32>
    tpu.vector_store %arg4[%c0_6, %c0_7], %7 {strides = array<i32>} : memref<16x512xf32, #tpu.memory_space<vmem>>, vector<16x512xf32>,
    return
  }
  func.func @transform_0(%arg0: i32) -> (i32, i32) {
    %c0_i32 = arith.constant 0 : i32
    %c0_i32_0 = arith.constant 0 : i32
    return %arg0, %c0_i32 : i32, i32
  }
  func.func @transform_1(%arg0: i32) -> (i32, i32) {
    %c0_i32 = arith.constant 0 : i32
    %c0_i32_0 = arith.constant 0 : i32
    %c0_i32_1 = arith.constant 0 : i32
    return %c0_i32, %c0_i32_0 : i32, i32
  }
  func.func @transform_2(%arg0: i32) -> (i32, i32) {
    %c0_i32 = arith.constant 0 : i32
    %c0_i32_0 = arith.constant 0 : i32
    %c0_i32_1 = arith.constant 0 : i32
    return %c0_i32, %c0_i32_0 : i32, i32
  }
  func.func @transform_3(%arg0: i32) -> (i32, i32) {
    %c0_i32 = arith.constant 0 : i32
    %c0_i32_0 = arith.constant 0 : i32
    return %arg0, %c0_i32 : i32, i32
  }
}

module attributes {stable_mosaic.version = 11 : i64} {
  func.func @conv_folded_kernel(%arg0: i32, %arg1: memref<16x256xbf16, #tpu.memory_space<vmem>>, %arg2: memref<256x512xbf16, #tpu.memory_space<vmem>>, %arg3: memref<1x512xf32, #tpu.memory_space<vmem>>, %arg4: memref<16x512xf32, #tpu.memory_space<vmem>>) attributes {dimension_semantics = [#tpu.dimension_semantics<parallel>], iteration_bounds = array<i64: 2>, scalar_prefetch = 0 : i64, scratch_operands = 0 : i64, tpu.core_type = #tpu.core_type<tc>, window_params = [{transform_indices = @transform_0, window_bounds = array<i64: 16, 256>}, {pipeline_mode = #tpu.pipeline_mode<synchronous>, transform_indices = @transform_1, window_bounds = array<i64: 256, 512>}, {pipeline_mode = #tpu.pipeline_mode<synchronous>, transform_indices = @transform_2, window_bounds = array<i64: 1, 512>}, {transform_indices = @transform_3, window_bounds = array<i64: 16, 512>}]} {
    %c0 = arith.constant 0 : index
    %c0_0 = arith.constant 0 : index
    %0 = vector.load %arg1[%c0, %c0_0] : memref<16x256xbf16, #tpu.memory_space<vmem>>, vector<16x256xbf16>
    %c0_1 = arith.constant 0 : index
    %c0_2 = arith.constant 0 : index
    %1 = vector.load %arg2[%c0_1, %c0_2] : memref<256x512xbf16, #tpu.memory_space<vmem>>, vector<256x512xbf16>
    %cst = arith.constant dense<0.000000e+00> : vector<16x512xf32>
    %2 = tpu.matmul %0, %1, %cst {dimension_numbers = #tpu.dot_dimension_numbers<[1], [0], [0], [1], [0, 0, 1, 1], [], []>} : vector<16x256xbf16>, vector<256x512xbf16>, vector<16x512xf32> -> vector<16x512xf32>
    %c0_3 = arith.constant 0 : index
    %c0_4 = arith.constant 0 : index
    %3 = vector.load %arg3[%c0_3, %c0_4] : memref<1x512xf32, #tpu.memory_space<vmem>>, vector<1x512xf32>
    %4 = vector.broadcast %3 : vector<1x512xf32> to vector<16x512xf32>
    %5 = arith.addf %2, %4 : vector<16x512xf32>
    %cst_5 = arith.constant 0.000000e+00 : f32
    %6 = vector.broadcast %cst_5 : f32 to vector<16x512xf32>
    %7 = arith.maximumf %5, %6 : vector<16x512xf32>
    %c0_6 = arith.constant 0 : index
    %c0_7 = arith.constant 0 : index
    %8 = vector.load %arg4[%c0_6, %c0_7] : memref<16x512xf32, #tpu.memory_space<vmem>>, vector<16x512xf32>
    tpu.vector_store %arg4[%c0_6, %c0_7], %7 {strides = array<i32>} : memref<16x512xf32, #tpu.memory_space<vmem>>, vector<16x512xf32>,
    return
  }
  func.func @transform_0(%arg0: i32) -> (i32, i32) {
    %c0_i32 = arith.constant 0 : i32
    %c0_i32_0 = arith.constant 0 : i32
    return %arg0, %c0_i32 : i32, i32
  }
  func.func @transform_1(%arg0: i32) -> (i32, i32) {
    %c0_i32 = arith.constant 0 : i32
    %c0_i32_0 = arith.constant 0 : i32
    %c0_i32_1 = arith.constant 0 : i32
    return %c0_i32, %c0_i32_0 : i32, i32
  }
  func.func @transform_2(%arg0: i32) -> (i32, i32) {
    %c0_i32 = arith.constant 0 : i32
    %c0_i32_0 = arith.constant 0 : i32
    %c0_i32_1 = arith.constant 0 : i32
    return %c0_i32, %c0_i32_0 : i32, i32
  }
  func.func @transform_3(%arg0: i32) -> (i32, i32) {
    %c0_i32 = arith.constant 0 : i32
    %c0_i32_0 = arith.constant 0 : i32
    return %arg0, %c0_i32 : i32, i32
  }
}

</mosaic_0001>

<bundles_post_ra>
// kernel: tpu_custom_call.1
= control target key start
LH: loop header
LB: loop body
LE: loop exit
PB: predicated region body
PF: predicated region fallthrough
CT: control target
= control target key end

     0   :  { %8 = vsyncpa [#allocation3], 0  ;;  %s1454_s0 = inlined_call_operand.hbm [shape: bf16[32,256], index: 0, kind: input, shape index: {}]   ;;  %s1455_s1 = inlined_call_operand.hbm [shape: bf16[256,512], index: 1, kind: input, shape index: {}]   ;;  %s1456_s2 = inlined_call_operand.vmem [shape: f32[1,512], index: 2, kind: input, shape index: {}]   ;;  %s1457_s3 = inlined_call_operand.hbm [shape: f32[32,512], index: 3, kind: output, shape index: {}]  }
   0x1   :  { %10 = vsyncpa [#allocation3 + $0x1], 0 }
   0x2   :  { %11 = vsyncpa [#allocation6], 0 }
   0x3   :  { %12 = vsyncpa [#allocation4], 0 }
   0x4   :  { %14 = vsyncpa [#allocation4 + $0x1], 0  ;;  %s1234_s12 = smov 0   ;;  %s1236_s13 = smov 0  }
   0x5   :  { %s1238_s14 = smov 0   ;;  %s1240_s15 = smov 0  }
   0x6 LB: > { %s1255_s16 = sadd.s32 4294967295, %s1203_s15   ;;  %s825_s17 = sadd.s32 4294967294, %s1203_s15   ;;  %s1203_s15 = sphi %s1240_s15, %s1477_s15   ;;  %s1199_s14 = sphi %s1238_s14, %s1476_s14   ;;  %s1195_s13 = sphi %s1236_s13, %s1475_s13   ;;  %s1191_s12 = sphi %s1234_s12, %s1474_s12  }
   0x7   : > { %p40_p0 = scmp.ne.s32.totalorder %s1195_s13, %s1191_s12  ;;  %p1458_p1 = scmp.eq.s32.totalorder %s1255_s16, 0 }
   0x8   : > { %p112_p3 = scmp.eq.s32.totalorder %s825_s17, 1  ;;  %p826_p5 = scmp.ge.s32.totalorder %s1203_s15, 1 }
   0x9   : > { %p1264_p4 = por %p1458_p1, %p40_p0  ;;  %p119_p7 = scmp.lt.s32.totalorder %s1203_s15, 3 }
   0xa   : > { %p1269_p6 = por %p112_p3, %p40_p0  ;;  %s1205_s21 = smov [#allocation5]  }
   0xb   : > { %s1461_s18 = scalar_select %p1264_p4, 1, 0 }
   0xc   : > { %s1462_s19 = scalar_select %p1269_p6, 1, 0 }
   0xd   : > { %p1274_p8 = pnand %p826_p5, %p119_p7  ;;  %s131_s22 = sshll.u32 %s1205_s21, 4  ;;  %s1278_s22 = int_to_ptr.vmem [resolvable:$true] %s131_s22 }
   0xe   : > { %s1290_s24 = sadd.s32 1, %s1203_s15   ;;  %s27_s25 = sadd.s32 1, %s1199_s14 }
   0xf   : > { %s1463_s20 = scalar_select %p1274_p8, 1, 0 }
  0x10   : > { %p921_p9 = pneg %p1274_p8  ;;  %s24_s26 = ssub.s32 %s1203_s15, %s1290_s24 }
  0x11   : > { %s1075_s29 = scalar_lea.hbm %s1455_s1, 8192 }
  0x12   : > { %p1285_p11 = pnand %p921_p9, %p1458_p1  ;;  %p1076_p12 = scmp.ne.s32.totalorder %s1455_s1, %s1075_s29 }
  0x13   : > { %p1082_p5 = scmp.lt.u32.totalorder %s1075_s29, %s1455_s1 }
  0x14   : > { %p1077_p13 = pneg %p1285_p11 }
  0x16   : > { %p1078_p0 = pnand %p1077_p13, %p1076_p12 }
  0x18   : > { %p1079_p3 = pneg %p1078_p0 }
  0x1a   : > { %p1084_p7 = pnand %p1082_p5, %p1079_p3 }
  0x1c   : > { %1087 = shalt.err (!%p1084_p7)
}
  0x1d   : > { %s1088_s7 = scalar_lea.vmem %s1278_s22, 8192  ;;  %p1096_p2 = scmp.lt.s32.totalorder %s1278_s22, %s1278_s22 }
  0x1e   : > { %p1089_p9 = scmp.ne.s32.totalorder %s1278_s22, %s1088_s7  ;;  %p1097_p6 = scmp.lt.s32.totalorder %s1088_s7, %s1088_s7 }
  0x20   : > { %p1091_p10 = pnand %p1089_p9, %p1077_p13  ;;  %p1098_p4 = por %p1097_p6, %p1096_p2 }
  0x22   : > { %p1092_p1 = pneg %p1091_p10 }
  0x24   : > { %p1099_p8 = pnand %p1098_p4, %p1092_p1 }
  0x26   : > { %1102 = shalt.err (!%p1099_p8)
}
  0x27   : > { %s1206_s8 = smov 256   ;;  %s1207_s9 = smov 16  }
  0x28   : > { %924 = dma.hbm_to_vmem [thread:$0]  (!%p1285_p11), %s1455_s1, 8192, %s1278_s22, [#allocation6], %s1206_s8, %s1206_s8, %s1207_s9  }
  0x29   : > { %p25_p2 = scmp.eq.s32.totalorder %s24_s26, 0  ;;  %p34_p1 = scmp.ne.s32.totalorder %s1199_s14, %s1195_s13 }
  0x2a   : > { %p35_p4 = scmp.eq.s32.totalorder %s1203_s15, 0  ;;  %p934_p6 = scmp.lt.s32.totalorder %s1203_s15, 2 }
  0x2b   : > { %s1321_s17 = scalar_select %p25_p2, %s1199_s14, %s27_s25  }
  0x2c   : > { %p36_p8 = por %p35_p4, %p34_p1  ;;  %p1465_p10 = scmp.eq.s32.totalorder %s1255_s16, 1 }
  0x2d   : > { %s148_s27 = sand.u32 1, %s1199_s14   ;;  %s910_s28 = sshll.u32 %s1203_s15, 8 }
  0x2e   : > { %p1325_p12 = por %p1465_p10, %p34_p1  ;;  %s829_s29 = sshll.u32 %s148_s27, 4 }
  0x2f   : > { %s1334_s4 = scalar_lea.hbm %s1454_s0, %s910_s28  ;;  %s152_s22 = scalar_lea.vmem [#allocation2], %s829_s29 }
  0x30   : > { %s160_s25 = sshll.u32 %s152_s22, 4  ;;  %p1336_p11 = pnand %p934_p6, %p36_p8  ;;  %s1340_s25 = int_to_ptr.vmem [resolvable:$true] %s160_s25 }
  0x31   : > { %s1342_s5 = scalar_lea.sflag [#allocation3], %s148_s27  ;;  %s1103_s6 = scalar_lea.hbm %s1334_s4, 256 }
  0x32   : > { %p1104_p13 = scmp.ne.s32.totalorder %s1334_s4, %s1103_s6  ;;  %p1105_p0 = pneg %p1336_p11 }
  0x33   : > { %s1108_s9 = scalar_lea.hbm %s1454_s0, 512  ;;  %p1109_p7 = scmp.lt.u32.totalorder %s1334_s4, %s1454_s0 }
  0x34   : > { %p1106_p3 = pnand %p1105_p0, %p1104_p13  ;;  %p1110_p9 = scmp.lt.u32.totalorder %s1108_s9, %s1103_s6 }
  0x35   : > { %p1112_p1 = scmp.lt.u32.totalorder %s1103_s6, %s1334_s4 }
  0x36   : > { %p1107_p5 = pneg %p1106_p3  ;;  %p1111_p2 = por %p1110_p9, %p1109_p7 }
  0x38   : > { %p1113_p4 = por %p1112_p1, %p1111_p2 }
  0x3a   : > { %p1114_p6 = pnand %p1113_p4, %p1107_p5 }
  0x3c   : > { %1117 = shalt.err (!%p1114_p6)
}
  0x3d   : > { %s1118_s27 = scalar_lea.vmem %s1340_s25, 256  ;;  %s1208_s28 = smov [#allocation2]  }
  0x3e   : > { %p1119_p8 = scmp.ne.s32.totalorder %s1340_s25, %s1118_s27  ;;  %s1123_s29 = sshll.u32 %s1208_s28, 4  ;;  %s1124_s29 = int_to_ptr.vmem [resolvable:$false] %s1123_s29 }
  0x3f   : > { %s1125_s23 = scalar_lea.vmem %s1124_s29, 512  ;;  %p1126_p3 = scmp.lt.s32.totalorder %s1340_s25, %s1124_s29 }
  0x40   : > { %p1121_p10 = pnand %p1119_p8, %p1105_p0  ;;  %p1127_p7 = scmp.lt.s32.totalorder %s1125_s23, %s1118_s27 }
  0x42   : > { %p1122_p13 = pneg %p1121_p10  ;;  %p1128_p9 = por %p1127_p7, %p1126_p3 }
  0x44   : > { %p1129_p2 = pnand %p1128_p9, %p1122_p13 }
  0x46   : > { %1132 = shalt.err (!%p1129_p2)
}
  0x47   : > { %s1209_s30 = smov 128   ;;  %s1210_s22 = smov 8  }
  0x48   : > { %928 = dma.hbm_to_vmem [thread:$0]  (!%p1336_p11), %s1334_s4, 256, %s1340_s25, %s1342_s5, %s1209_s30, %s1209_s30, %s1210_s22  }
  0x49   : > { %p1468_p0 = scmp.ne.s32.totalorder %s1463_s20, 0 }
  0x4a   : > { %s1373_s6 = sand.u32 (!%p1468_p0), 1, %s1195_s13   ;;  %p1469_p5 = scmp.ne.s32.totalorder (!%p1468_p0), %s1461_s18, 0 }
  0x4b   : > { %172 = sbr.rel (%p1468_p0) target bundleno = 385 (0x181), region = 32  ;;  %s834_s7 = sshll.u32 (!%p1468_p0), %s1373_s6, 4 }
  0x4c   : > { %s175_s8 = scalar_lea.sflag (!%p1468_p0), [#allocation3], %s1373_s6  ;;  %s1377_s9 = scalar_lea.vmem (!%p1468_p0), [#allocation2], %s834_s7 }
  0x52   : > { %1178 = dma.done.wait (%p1469_p5), %s175_s8, 256  }
  0x53   : > { %1180 = vsyncadd (%p1469_p5), %s175_s8, 4294967040  ;;  %p1470_p11 = scmp.eq.s32.totalorder %s1255_s16, 0 }
  0x55   : > { %1182 = dma.done.wait (%p1470_p11), [#allocation6], 8192   ;;  %p1471_p1 = pmov %p1470_p11 }
  0x56   : > { %v976_v0 = vld [vmem:[#allocation5 + $0x4] ss:$16 sps:$4 sm:$0xff]   ;;  %v978_v1 = vld [vmem:[#allocation5 + $0xc] ss:$16 sps:$4 sm:$0xff]   ;;  %v980_v2 = vld [vmem:[#allocation5] ss:$16 sps:$4 sm:$0xff]  }
  0x57   : > { %1184 = vsyncadd (%p1471_p1), [#allocation6], 4294959104  ;;  %625 = vmatprep.subr.bf16.mxu0 %v976_v0  ;;  %v981_v3 = vld [vmem:[#allocation5 + $0x8] ss:$16 sps:$4 sm:$0xff]   ;;  %668 = vmatprep.subr.bf16.mxu1 %v978_v1  ;;  %v982_v4 = vld [vmem:[#allocation5 + $0x24] ss:$16 sps:$4 sm:$0xff]  }
  0x58   : > { %626 = vmatpush1.bf16.msra.mxu0 %v980_v2  ;;  %669 = vmatpush1.bf16.msra.mxu1 %v981_v3  ;;  %v984_v5 = vld [vmem:[#allocation5 + $0x2c] ss:$16 sps:$4 sm:$0xff]   ;;  %v986_v6 = vld [vmem:[#allocation5 + $0x20] ss:$16 sps:$4 sm:$0xff]   ;;  %v987_v7 = vld [vmem:[#allocation5 + $0x28] ss:$16 sps:$4 sm:$0xff]   ;;  %v275_v2 = vlaneseq }
  0x59   : > { %627 = vmatprep.subr.bf16.mxu0 %v982_v4  ;;  %670 = vmatprep.subr.bf16.mxu1 %v984_v5  ;;  %v988_v8 = vld [vmem:[#allocation5 + $0x44] ss:$16 sps:$4 sm:$0xff]   ;;  %v990_v9 = vld [vmem:[#allocation5 + $0x4c] ss:$16 sps:$4 sm:$0xff]   ;;  %v992_v10 = vld [vmem:[#allocation5 + $0x40] ss:$16 sps:$4 sm:$0xff]  }
  0x5a   : > { %v993_v11 = vld [vmem:[#allocation5 + $0x48] ss:$16 sps:$4 sm:$0xff]   ;;  %v994_v12 = vld [vmem:[#allocation5 + $0x64] ss:$16 sps:$4 sm:$0xff]   ;;  %v996_v13 = vld [vmem:[#allocation5 + $0x6c] ss:$16 sps:$4 sm:$0xff]  }
  0x5b   : > { %v998_v14 = vld [vmem:[#allocation5 + $0x60] ss:$16 sps:$4 sm:$0xff]   ;;  %v999_v15 = vld [vmem:[#allocation5 + $0x68] ss:$16 sps:$4 sm:$0xff]   ;;  %v1000_v16 = vld [vmem:[#allocation5 + $0x84] ss:$16 sps:$4 sm:$0xff]  }
  0x5c   : > { %628 = vmatpush1.bf16.msra.mxu0 %v986_v6  ;;  %671 = vmatpush1.bf16.msra.mxu1 %v987_v7  ;;  %v1002_v17 = vld [vmem:[#allocation5 + $0x8c] ss:$16 sps:$4 sm:$0xff]   ;;  %v1004_v18 = vld [vmem:[#allocation5 + $0x80] ss:$16 sps:$4 sm:$0xff]   ;;  %v1005_v19 = vld [vmem:[#allocation5 + $0x88] ss:$16 sps:$4 sm:$0xff]  }
  0x5d   : > { %629 = vmatprep.subr.bf16.mxu0 %v988_v8  ;;  %672 = vmatprep.subr.bf16.mxu1 %v990_v9  ;;  %v1006_v20 = vld [vmem:[#allocation5 + $0xa4] ss:$16 sps:$4 sm:$0xff]   ;;  %v1008_v21 = vld [vmem:[#allocation5 + $0xac] ss:$16 sps:$4 sm:$0xff]   ;;  %v1010_v22 = vld [vmem:[#allocation5 + $0xa0] ss:$16 sps:$4 sm:$0xff]  }
  0x5e   : > { %v1011_v23 = vld [vmem:[#allocation5 + $0xa8] ss:$16 sps:$4 sm:$0xff]   ;;  %v1012_v24 = vld [vmem:[#allocation5 + $0xc4] ss:$16 sps:$4 sm:$0xff]   ;;  %v1014_v25 = vld [vmem:[#allocation5 + $0xcc] ss:$16 sps:$4 sm:$0xff]  }
  0x5f   : > { %v1016_v26 = vld [vmem:[#allocation5 + $0xc0] ss:$16 sps:$4 sm:$0xff]   ;;  %v1017_v27 = vld [vmem:[#allocation5 + $0xc8] ss:$16 sps:$4 sm:$0xff]   ;;  %v1018_v28 = vld [vmem:[#allocation5 + $0xe4] ss:$16 sps:$4 sm:$0xff]  }
  0x60   : > { %630 = vmatpush1.bf16.msra.mxu0 %v992_v10  ;;  %673 = vmatpush1.bf16.msra.mxu1 %v993_v11  ;;  %v1020_v29 = vld [vmem:[#allocation5 + $0xec] ss:$16 sps:$4 sm:$0xff]   ;;  %v1022_v30 = vld [vmem:[#allocation5 + $0xe0] ss:$16 sps:$4 sm:$0xff]   ;;  %v1023_v31 = vld [vmem:[#allocation5 + $0xe8] ss:$16 sps:$4 sm:$0xff]  }
  0x61   : > { %631 = vmatprep.subr.bf16.mxu0 %v994_v12  ;;  %674 = vmatprep.subr.bf16.mxu1 %v996_v13  ;;  %v1024_v32 = vld [vmem:[#allocation5 + $0x104] ss:$16 sps:$4 sm:$0xff]   ;;  %v1026_v33 = vld [vmem:[#allocation5 + $0x10c] ss:$16 sps:$4 sm:$0xff]   ;;  %v1028_v34 = vld [vmem:[#allocation5 + $0x100] ss:$16 sps:$4 sm:$0xff]  }
  0x62   : > { %v1029_v35 = vld [vmem:[#allocation5 + $0x108] ss:$16 sps:$4 sm:$0xff]   ;;  %v1030_v36 = vld [vmem:[#allocation5 + $0x124] ss:$16 sps:$4 sm:$0xff]   ;;  %v1032_v37 = vld [vmem:[#allocation5 + $0x12c] ss:$16 sps:$4 sm:$0xff]  }
  0x63   : > { %v1034_v38 = vld [vmem:[#allocation5 + $0x120] ss:$16 sps:$4 sm:$0xff]   ;;  %v1035_v39 = vld [vmem:[#allocation5 + $0x128] ss:$16 sps:$4 sm:$0xff]   ;;  %v1036_v40 = vld [vmem:[#allocation5 + $0x144] ss:$16 sps:$4 sm:$0xff]  }
  0x64   : > { %632 = vmatpush1.bf16.msra.mxu0 %v998_v14  ;;  %675 = vmatpush1.bf16.msra.mxu1 %v999_v15  ;;  %v1038_v41 = vld [vmem:[#allocation5 + $0x14c] ss:$16 sps:$4 sm:$0xff]   ;;  %v1040_v42 = vld [vmem:[#allocation5 + $0x140] ss:$16 sps:$4 sm:$0xff]   ;;  %v1041_v43 = vld [vmem:[#allocation5 + $0x148] ss:$16 sps:$4 sm:$0xff]  }
  0x65   : > { %633 = vmatprep.subr.bf16.mxu0 %v1000_v16  ;;  %676 = vmatprep.subr.bf16.mxu1 %v1002_v17  ;;  %v1042_v44 = vld [vmem:[#allocation5 + $0x164] ss:$16 sps:$4 sm:$0xff]   ;;  %v1044_v45 = vld [vmem:[#allocation5 + $0x16c] ss:$16 sps:$4 sm:$0xff]   ;;  %v1046_v47 = vld [vmem:[#allocation5 + $0x160] ss:$16 sps:$4 sm:$0xff]  }
  0x66   : > { %v1074_v46 = vld [vmem:[%s1377_s9 + $0x4] ss:$8 sps:$4 sm:$0xff]   ;;  %v1047_v48 = vld [vmem:[#allocation5 + $0x168] ss:$16 sps:$4 sm:$0xff]   ;;  %v1052_v51 = vld [vmem:[#allocation5 + $0x180] ss:$16 sps:$4 sm:$0xff]  }
  0x67   : > { %v1048_v49 = vld [vmem:[#allocation5 + $0x184] ss:$16 sps:$4 sm:$0xff]   ;;  %v1050_v50 = vld [vmem:[#allocation5 + $0x18c] ss:$16 sps:$4 sm:$0xff]   ;;  %657 = vmatprep.mubr.bf16.mxu0 %v1074_v46  ;;  %700 = vmatprep.mubr.bf16.mxu1 %v1074_v46  ;;  %v1053_v52 = vld [vmem:[#allocation5 + $0x188] ss:$16 sps:$4 sm:$0xff]  }
  0x68   : > { %634 = vmatpush1.bf16.msra.mxu0 %v1004_v18  ;;  %677 = vmatpush1.bf16.msra.mxu1 %v1005_v19  ;;  %v1054_v53 = vld [vmem:[#allocation5 + $0x1a4] ss:$16 sps:$4 sm:$0xff]   ;;  %v1056_v54 = vld [vmem:[#allocation5 + $0x1ac] ss:$16 sps:$4 sm:$0xff]   ;;  %v1058_v55 = vld [vmem:[#allocation5 + $0x1a0] ss:$16 sps:$4 sm:$0xff]  }
  0x69   : > { %635 = vmatprep.subr.bf16.mxu0 %v1006_v20  ;;  %678 = vmatprep.subr.bf16.mxu1 %v1008_v21  ;;  %v1059_v56 = vld [vmem:[#allocation5 + $0x1a8] ss:$16 sps:$4 sm:$0xff]   ;;  %v1060_v57 = vld [vmem:[#allocation5 + $0x1c4] ss:$16 sps:$4 sm:$0xff]   ;;  %v1062_v58 = vld [vmem:[#allocation5 + $0x1cc] ss:$16 sps:$4 sm:$0xff]  }
  0x6a   : > { %v1064_v59 = vld [vmem:[#allocation5 + $0x1c0] ss:$16 sps:$4 sm:$0xff]   ;;  %v1065_v60 = vld [vmem:[#allocation5 + $0x1c8] ss:$16 sps:$4 sm:$0xff]   ;;  %v1066_v61 = vld [vmem:[#allocation5 + $0x1e4] ss:$16 sps:$4 sm:$0xff]  }
  0x6b   : > { %v1068_v62 = vld [vmem:[#allocation5 + $0x1ec] ss:$16 sps:$4 sm:$0xff]   ;;  %v1070_v63 = vld [vmem:[#allocation5 + $0x1e0] ss:$16 sps:$4 sm:$0xff]   ;;  %v1071_v0 = vld [vmem:[#allocation5 + $0x1e8] ss:$16 sps:$4 sm:$0xff]  }
  0x6c   : > { %636 = vmatpush1.bf16.msra.mxu0 %v1010_v22  ;;  %679 = vmatpush1.bf16.msra.mxu1 %v1011_v23  ;;  %v1072_v1 = vld [vmem:[%s1377_s9] ss:$8 sps:$4 sm:$0xff]   ;;  %v276_v3 = vshrl.u32 %v275_v2, 7  ;;  %s836_s4 = sshll.u32 %s1373_s6, 6  ;;  %s912_s5 = sshll.u32 %s1255_s16, 10 }
  0x6d   : > { %637 = vmatprep.subr.bf16.mxu0 %v1012_v24  ;;  %680 = vmatprep.subr.bf16.mxu1 %v1014_v25  ;;  %v273_v6 = vld [vmem:[%s1456_s2] sm:$0xf]  ;;  %s1393_s25 = scalar_lea.vmem [#allocation7], %s836_s4  ;;  %s1404_s11 = scalar_lea.hbm %s1457_s3, %s912_s5 }
  0x6e   : > { %v277_v4 = vsub.s32 0, %v276_v3  ;;  %v285_v5 = vsub.s32 2, %v276_v3  ;;  %v281_v7 = vsub.s32 1, %v276_v3  ;;  %v289_v8 = vsub.s32 3, %v276_v3  ;;  %s742_s26 = sshll.u32 %s1393_s25, 4  ;;  %s728_s27 = scalar_lea.sflag [#allocation4], %s1373_s6  ;;  %s1397_s26 = int_to_ptr.vmem [resolvable:$true] %s742_s26 }
  0x6f   : > { %s1133_s28 = scalar_lea.vmem %s1397_s26, 1024  ;;  %s1211_s29 = smov [#allocation7]  }
  0x70   : > { %638 = vmatpush1.bf16.msra.mxu0 %v1016_v26  ;;  %681 = vmatpush1.bf16.msra.mxu1 %v1017_v27  ;;  %v278_v9 = vrot.slane %v273_v6, %v277_v4  ;;  %v286_v10 = vrot.slane %v273_v6, %v285_v5  ;;  %v282_v11 = vrot.slane %v273_v6, %v281_v7  ;;  %p1134_p4 = scmp.ne.s32.totalorder %s1397_s26, %s1133_s28  ;;  %s1137_s23 = sshll.u32 %s1211_s29, 4  ;;  %s1138_s23 = int_to_ptr.vmem [resolvable:$false] %s1137_s23 }
  0x71   : > { %639 = vmatprep.subr.bf16.mxu0 %v1018_v28  ;;  %682 = vmatprep.subr.bf16.mxu1 %v1020_v29  ;;  %v290_v12 = vrot.slane %v273_v6, %v289_v8  ;;  %s1139_s30 = scalar_lea.vmem %s1138_s23, 2048  ;;  %p1140_p10 = scmp.lt.s32.totalorder %s1397_s26, %s1138_s23 }
  0x72   : > { %p1135_p6 = pnand %p1134_p4, %p1325_p12  ;;  %p1141_p13 = scmp.lt.s32.totalorder %s1139_s30, %s1133_s28 }
  0x74   : > { %640 = vmatpush1.bf16.msra.mxu0 %v1022_v30  ;;  %683 = vmatpush1.bf16.msra.mxu1 %v1023_v31  ;;  %p1136_p8 = pneg %p1135_p6  ;;  %p1142_p3 = por %p1141_p13, %p1140_p10 }
  0x75   : > { %641 = vmatprep.subr.bf16.mxu0 %v1024_v32  ;;  %684 = vmatprep.subr.bf16.mxu1 %v1026_v33 }
  0x76   : > { %p1143_p7 = pnand %p1142_p3, %p1136_p8 }
  0x78   : > { %642 = vmatpush1.bf16.msra.mxu0 %v1028_v34  ;;  %685 = vmatpush1.bf16.msra.mxu1 %v1029_v35 }
  0x79   : > { %643 = vmatprep.subr.bf16.mxu0 %v1030_v36  ;;  %686 = vmatprep.subr.bf16.mxu1 %v1032_v37 }
  0x7c   : > { %644 = vmatpush1.bf16.msra.mxu0 %v1034_v38  ;;  %687 = vmatpush1.bf16.msra.mxu1 %v1035_v39 }
  0x7d   : > { %645 = vmatprep.subr.bf16.mxu0 %v1036_v40  ;;  %688 = vmatprep.subr.bf16.mxu1 %v1038_v41 }
  0x80   : > { %646 = vmatpush1.bf16.msra.mxu0 %v1040_v42  ;;  %689 = vmatpush1.bf16.msra.mxu1 %v1041_v43 }
  0x81   : > { %647 = vmatprep.subr.bf16.mxu0 %v1042_v44  ;;  %690 = vmatprep.subr.bf16.mxu1 %v1044_v45 }
  0x84   : > { %648 = vmatpush1.bf16.msra.mxu0 %v1046_v47  ;;  %691 = vmatpush1.bf16.msra.mxu1 %v1047_v48 }
  0x85   : > { %649 = vmatprep.subr.bf16.mxu0 %v1048_v49  ;;  %692 = vmatprep.subr.bf16.mxu1 %v1050_v50 }
  0x88   : > { %650 = vmatpush1.bf16.msra.mxu0 %v1052_v51  ;;  %693 = vmatpush1.bf16.msra.mxu1 %v1053_v52 }
  0x89   : > { %651 = vmatprep.subr.bf16.mxu0 %v1054_v53  ;;  %694 = vmatprep.subr.bf16.mxu1 %v1056_v54 }
  0x8c   : > { %652 = vmatpush1.bf16.msra.mxu0 %v1058_v55  ;;  %695 = vmatpush1.bf16.msra.mxu1 %v1059_v56 }
  0x8d   : > { %653 = vmatprep.subr.bf16.mxu0 %v1060_v57  ;;  %696 = vmatprep.subr.bf16.mxu1 %v1062_v58 }
  0x90   : > { %654 = vmatpush1.bf16.msra.mxu0 %v1064_v59  ;;  %697 = vmatpush1.bf16.msra.mxu1 %v1065_v60 }
  0x91   : > { %655 = vmatprep.subr.bf16.mxu0 %v1066_v61  ;;  %698 = vmatprep.subr.bf16.mxu1 %v1068_v62 }
  0x94   : > { %656 = vmatpush1.bf16.msra.mxu0 %v1070_v63  ;;  %699 = vmatpush1.bf16.msra.mxu1 %v1071_v0 }
  0x97   : > { %658 = vmatmul.mubr.bf16.vlgmr.msra.gmra.mrb[0].mxu0 %v1072_v1  ;;  %701 = vmatmul.mubr.bf16.vlgmr.msra.gmra.mrb[0].mxu1 %v1072_v1 }
 0x16a   : > { %v659_v13 = vpop.f32.mrb[0].mxu0  ;;  %v702_v14 = vpop.f32.mrb[0].mxu1 }
 0x16b   : > { %v660_v15 = vadd.f32 %v659_v13, %v278_v9  ;;  %v703_v16 = vadd.f32 %v702_v14, %v286_v10  ;;  %v661_v17 = vpop.f32.mrb[1].mxu0  ;;  %v704_v18 = vpop.f32.mrb[1].mxu1 }
 0x16c   : > { %v662_v19 = vadd.f32 %v661_v17, %v282_v11  ;;  %v705_v20 = vadd.f32 %v704_v18, %v290_v12  ;;  %v663_v21 = vpop.f32.mrb[2].mxu0  ;;  %v706_v22 = vpop.f32.mrb[2].mxu1 }
 0x16d   : > { %v711_v23 = vmax.f32 %v660_v15, 0.0  ;;  %v713_v24 = vmax.f32 %v703_v16, 0.0  ;;  %v664_v25 = vadd.f32 %v663_v21, %v278_v9  ;;  %v707_v26 = vadd.f32 %v706_v22, %v286_v10  ;;  %v665_v27 = vpop.f32.mrb[3].mxu0  ;;  %v708_v28 = vpop.f32.mrb[3].mxu1 }
 0x16e   : > { %v712_v29 = vmax.f32 %v662_v19, 0.0  ;;  %v714_v30 = vmax.f32 %v705_v20, 0.0  ;;  %v666_v31 = vadd.f32 %v665_v27, %v282_v11  ;;  %v709_v32 = vadd.f32 %v708_v28, %v290_v12 }
 0x16f   : > { %719 = vst [vmem:[%s1393_s25] sm:$0xff] %v711_v23  ;;  %721 = vst [vmem:[%s1393_s25 + $0x10] sm:$0xff] %v713_v24  ;;  %v715_v33 = vmax.f32 %v664_v25, 0.0  ;;  %v717_v34 = vmax.f32 %v707_v26, 0.0 }
 0x170   : > { %720 = vst [vmem:[%s1393_s25 + $0x8] sm:$0xff] %v712_v29  ;;  %722 = vst [vmem:[%s1393_s25 + $0x18] sm:$0xff] %v714_v30  ;;  %v716_v35 = vmax.f32 %v666_v31, 0.0  ;;  %v718_v36 = vmax.f32 %v709_v32, 0.0 }
 0x171   : > { %723 = vst [vmem:[%s1393_s25 + $0x20] sm:$0xff] %v715_v33  ;;  %725 = vst [vmem:[%s1393_s25 + $0x30] sm:$0xff] %v717_v34 }
 0x172   : > { %724 = vst [vmem:[%s1393_s25 + $0x28] sm:$0xff] %v716_v35  ;;  %726 = vst [vmem:[%s1393_s25 + $0x38] sm:$0xff] %v718_v36 }
 0x173   : > { %1146 = shalt.err (!%p1143_p7)
}
 0x174   : > { %s1147_s22 = scalar_lea.hbm %s1404_s11, 1024  ;;  %s1151_s9 = scalar_lea.hbm %s1457_s3, 2048 }
 0x175   : > { %p1148_p9 = scmp.ne.s32.totalorder %s1404_s11, %s1147_s22  ;;  %p1152_p5 = scmp.lt.u32.totalorder %s1404_s11, %s1457_s3 }
 0x176   : > { %p1153_p11 = scmp.lt.u32.totalorder %s1151_s9, %s1147_s22  ;;  %p1155_p4 = scmp.lt.u32.totalorder %s1147_s22, %s1404_s11 }
 0x177   : > { %p1149_p2 = pnand %p1148_p9, %p1325_p12 }
 0x178   : > { %p1154_p1 = por %p1153_p11, %p1152_p5 }
 0x179   : > { %p1150_p0 = pneg %p1149_p2 }
 0x17a   : > { %p1156_p6 = por %p1155_p4, %p1154_p1 }
 0x17c   : > { %p1157_p8 = pnand %p1156_p6, %p1150_p0 }
 0x17e   : > { %1160 = shalt.err (!%p1157_p8)
}
 0x17f   : > { %s1212_s4 = smov 512   ;;  %s1213_s25 = smov 32  }
 0x180   : > { %919 = dma.vmem_to_hbm [thread:$0]  (%p1325_p12), %s1397_s26, 1024, %s1404_s11, %s728_s27, %s1212_s4, %s1212_s4, %s1213_s25  }
 0x181 PF: > { %s757_s5 = sand.u32 1, %s1191_s12   ;;  %p1472_p10 = scmp.ne.s32.totalorder %s1462_s19, 0 }
 0x182   : > { %p1473_p13 = scmp.ge.s32.totalorder %s1203_s15, 2  ;;  %s758_s16 = scalar_lea.sflag [#allocation4], %s757_s5 }
 0x184   : > { %p930_p3 = pnand %p1473_p13, %p1472_p10 }
 0x186   : > { %1186 = dma.done.wait (!%p930_p3), %s758_s16, 1024  }
 0x187   : > { %1188 = vsyncadd (!%p930_p3), %s758_s16, 4294966272  ;;  %p17_p7 = scmp.ge.s32.totalorder %s1290_s24, 4   ;;  %s1474_s12 = smov %s1195_s13 }
 0x188   : > { %s1475_s13 = smov %s1199_s14  ;;  %s1476_s14 = smov %s1321_s17 }
 0x189   : > { %s1477_s15 = smov %s1290_s24  ;;  %19 = sbr.rel (!%p17_p7) target bundleno = 6 (0x6), region = 81 }
 0x190   :  { %763 = vsyncpa [#allocation3], 1 }
 0x191   :  { %765 = vsyncpa [#allocation3 + $0x1], 1 }
 0x192   :  { %766 = vsyncpa [#allocation6], 1 }
 0x193   :  { %767 = vsyncpa [#allocation4], 1 }
 0x194   :  { %769 = vsyncpa [#allocation4 + $0x1], 1 }

// kernel: tpu_custom_call.1
= control target key start
LH: loop header
LB: loop body
LE: loop exit
PB: predicated region body
PF: predicated region fallthrough
CT: control target
= control target key end

     0   :  { %8 = vsyncpa [#allocation3], 0  ;;  %s1454_s0 = inlined_call_operand.hbm [shape: bf16[32,256], index: 0, kind: input, shape index: {}]   ;;  %s1455_s1 = inlined_call_operand.hbm [shape: bf16[256,512], index: 1, kind: input, shape index: {}]   ;;  %s1456_s2 = inlined_call_operand.vmem [shape: f32[1,512], index: 2, kind: input, shape index: {}]   ;;  %s1457_s3 = inlined_call_operand.hbm [shape: f32[32,512], index: 3, kind: output, shape index: {}]  }
   0x1   :  { %10 = vsyncpa [#allocation3 + $0x1], 0 }
   0x2   :  { %11 = vsyncpa [#allocation6], 0 }
   0x3   :  { %12 = vsyncpa [#allocation4], 0 }
   0x4   :  { %14 = vsyncpa [#allocation4 + $0x1], 0  ;;  %s1234_s12 = smov 0   ;;  %s1236_s13 = smov 0  }
   0x5   :  { %s1238_s14 = smov 0   ;;  %s1240_s15 = smov 0  }
   0x6 LB: > { %s1255_s16 = sadd.s32 4294967295, %s1203_s15   ;;  %s825_s17 = sadd.s32 4294967294, %s1203_s15   ;;  %s1203_s15 = sphi %s1240_s15, %s1477_s15   ;;  %s1199_s14 = sphi %s1238_s14, %s1476_s14   ;;  %s1195_s13 = sphi %s1236_s13, %s1475_s13   ;;  %s1191_s12 = sphi %s1234_s12, %s1474_s12  }
   0x7   : > { %p40_p0 = scmp.ne.s32.totalorder %s1195_s13, %s1191_s12  ;;  %p1458_p1 = scmp.eq.s32.totalorder %s1255_s16, 0 }
   0x8   : > { %p112_p3 = scmp.eq.s32.totalorder %s825_s17, 1  ;;  %p826_p5 = scmp.ge.s32.totalorder %s1203_s15, 1 }
   0x9   : > { %p1264_p4 = por %p1458_p1, %p40_p0  ;;  %p119_p7 = scmp.lt.s32.totalorder %s1203_s15, 3 }
   0xa   : > { %p1269_p6 = por %p112_p3, %p40_p0  ;;  %s1205_s21 = smov [#allocation5]  }
   0xb   : > { %s1461_s18 = scalar_select %p1264_p4, 1, 0 }
   0xc   : > { %s1462_s19 = scalar_select %p1269_p6, 1, 0 }
   0xd   : > { %p1274_p8 = pnand %p826_p5, %p119_p7  ;;  %s131_s22 = sshll.u32 %s1205_s21, 4  ;;  %s1278_s22 = int_to_ptr.vmem [resolvable:$true] %s131_s22 }
   0xe   : > { %s1290_s24 = sadd.s32 1, %s1203_s15   ;;  %s27_s25 = sadd.s32 1, %s1199_s14 }
   0xf   : > { %s1463_s20 = scalar_select %p1274_p8, 1, 0 }
  0x10   : > { %p921_p9 = pneg %p1274_p8  ;;  %s24_s26 = ssub.s32 %s1203_s15, %s1290_s24 }
  0x11   : > { %s1075_s29 = scalar_lea.hbm %s1455_s1, 8192 }
  0x12   : > { %p1285_p11 = pnand %p921_p9, %p1458_p1  ;;  %p1076_p12 = scmp.ne.s32.totalorder %s1455_s1, %s1075_s29 }
  0x13   : > { %p1082_p5 = scmp.lt.u32.totalorder %s1075_s29, %s1455_s1 }
  0x14   : > { %p1077_p13 = pneg %p1285_p11 }
  0x16   : > { %p1078_p0 = pnand %p1077_p13, %p1076_p12 }
  0x18   : > { %p1079_p3 = pneg %p1078_p0 }
  0x1a   : > { %p1084_p7 = pnand %p1082_p5, %p1079_p3 }
  0x1c   : > { %1087 = shalt.err (!%p1084_p7)
}
  0x1d   : > { %s1088_s7 = scalar_lea.vmem %s1278_s22, 8192  ;;  %p1096_p2 = scmp.lt.s32.totalorder %s1278_s22, %s1278_s22 }
  0x1e   : > { %p1089_p9 = scmp.ne.s32.totalorder %s1278_s22, %s1088_s7  ;;  %p1097_p6 = scmp.lt.s32.totalorder %s1088_s7, %s1088_s7 }
  0x20   : > { %p1091_p10 = pnand %p1089_p9, %p1077_p13  ;;  %p1098_p4 = por %p1097_p6, %p1096_p2 }
  0x22   : > { %p1092_p1 = pneg %p1091_p10 }
  0x24   : > { %p1099_p8 = pnand %p1098_p4, %p1092_p1 }
  0x26   : > { %1102 = shalt.err (!%p1099_p8)
}
  0x27   : > { %s1206_s8 = smov 256   ;;  %s1207_s9 = smov 16  }
  0x28   : > { %924 = dma.hbm_to_vmem [thread:$0]  (!%p1285_p11), %s1455_s1, 8192, %s1278_s22, [#allocation6], %s1206_s8, %s1206_s8, %s1207_s9  }
  0x29   : > { %p25_p2 = scmp.eq.s32.totalorder %s24_s26, 0  ;;  %p34_p1 = scmp.ne.s32.totalorder %s1199_s14, %s1195_s13 }
  0x2a   : > { %p35_p4 = scmp.eq.s32.totalorder %s1203_s15, 0  ;;  %p934_p6 = scmp.lt.s32.totalorder %s1203_s15, 2 }
  0x2b   : > { %s1321_s17 = scalar_select %p25_p2, %s1199_s14, %s27_s25  }
  0x2c   : > { %p36_p8 = por %p35_p4, %p34_p1  ;;  %p1465_p10 = scmp.eq.s32.totalorder %s1255_s16, 1 }
  0x2d   : > { %s148_s27 = sand.u32 1, %s1199_s14   ;;  %s910_s28 = sshll.u32 %s1203_s15, 8 }
  0x2e   : > { %p1325_p12 = por %p1465_p10, %p34_p1  ;;  %s829_s29 = sshll.u32 %s148_s27, 4 }
  0x2f   : > { %s1334_s4 = scalar_lea.hbm %s1454_s0, %s910_s28  ;;  %s152_s22 = scalar_lea.vmem [#allocation2], %s829_s29 }
  0x30   : > { %s160_s25 = sshll.u32 %s152_s22, 4  ;;  %p1336_p11 = pnand %p934_p6, %p36_p8  ;;  %s1340_s25 = int_to_ptr.vmem [resolvable:$true] %s160_s25 }
  0x31   : > { %s1342_s5 = scalar_lea.sflag [#allocation3], %s148_s27  ;;  %s1103_s6 = scalar_lea.hbm %s1334_s4, 256 }
  0x32   : > { %p1104_p13 = scmp.ne.s32.totalorder %s1334_s4, %s1103_s6  ;;  %p1105_p0 = pneg %p1336_p11 }
  0x33   : > { %s1108_s9 = scalar_lea.hbm %s1454_s0, 512  ;;  %p1109_p7 = scmp.lt.u32.totalorder %s1334_s4, %s1454_s0 }
  0x34   : > { %p1106_p3 = pnand %p1105_p0, %p1104_p13  ;;  %p1110_p9 = scmp.lt.u32.totalorder %s1108_s9, %s1103_s6 }
  0x35   : > { %p1112_p1 = scmp.lt.u32.totalorder %s1103_s6, %s1334_s4 }
  0x36   : > { %p1107_p5 = pneg %p1106_p3  ;;  %p1111_p2 = por %p1110_p9, %p1109_p7 }
  0x38   : > { %p1113_p4 = por %p1112_p1, %p1111_p2 }
  0x3a   : > { %p1114_p6 = pnand %p1113_p4, %p1107_p5 }
  0x3c   : > { %1117 = shalt.err (!%p1114_p6)
}
  0x3d   : > { %s1118_s27 = scalar_lea.vmem %s1340_s25, 256  ;;  %s1208_s28 = smov [#allocation2]  }
  0x3e   : > { %p1119_p8 = scmp.ne.s32.totalorder %s1340_s25, %s1118_s27  ;;  %s1123_s29 = sshll.u32 %s1208_s28, 4  ;;  %s1124_s29 = int_to_ptr.vmem [resolvable:$false] %s1123_s29 }
  0x3f   : > { %s1125_s23 = scalar_lea.vmem %s1124_s29, 512  ;;  %p1126_p3 = scmp.lt.s32.totalorder %s1340_s25, %s1124_s29 }
  0x40   : > { %p1121_p10 = pnand %p1119_p8, %p1105_p0  ;;  %p1127_p7 = scmp.lt.s32.totalorder %s1125_s23, %s1118_s27 }
  0x42   : > { %p1122_p13 = pneg %p1121_p10  ;;  %p1128_p9 = por %p1127_p7, %p1126_p3 }
  0x44   : > { %p1129_p2 = pnand %p1128_p9, %p1122_p13 }
  0x46   : > { %1132 = shalt.err (!%p1129_p2)
}
  0x47   : > { %s1209_s30 = smov 128   ;;  %s1210_s22 = smov 8  }
  0x48   : > { %928 = dma.hbm_to_vmem [thread:$0]  (!%p1336_p11), %s1334_s4, 256, %s1340_s25, %s1342_s5, %s1209_s30, %s1209_s30, %s1210_s22  }
  0x49   : > { %p1468_p0 = scmp.ne.s32.totalorder %s1463_s20, 0 }
  0x4a   : > { %s1373_s6 = sand.u32 (!%p1468_p0), 1, %s1195_s13   ;;  %p1469_p5 = scmp.ne.s32.totalorder (!%p1468_p0), %s1461_s18, 0 }
  0x4b   : > { %172 = sbr.rel (%p1468_p0) target bundleno = 385 (0x181), region = 32  ;;  %s834_s7 = sshll.u32 (!%p1468_p0), %s1373_s6, 4 }
  0x4c   : > { %s175_s8 = scalar_lea.sflag (!%p1468_p0), [#allocation3], %s1373_s6  ;;  %s1377_s9 = scalar_lea.vmem (!%p1468_p0), [#allocation2], %s834_s7 }
  0x52   : > { %1178 = dma.done.wait (%p1469_p5), %s175_s8, 256  }
  0x53   : > { %1180 = vsyncadd (%p1469_p5), %s175_s8, 4294967040  ;;  %p1470_p11 = scmp.eq.s32.totalorder %s1255_s16, 0 }
  0x55   : > { %1182 = dma.done.wait (%p1470_p11), [#allocation6], 8192   ;;  %p1471_p1 = pmov %p1470_p11 }
  0x56   : > { %v976_v0 = vld [vmem:[#allocation5 + $0x4] ss:$16 sps:$4 sm:$0xff]   ;;  %v978_v1 = vld [vmem:[#allocation5 + $0xc] ss:$16 sps:$4 sm:$0xff]   ;;  %v980_v2 = vld [vmem:[#allocation5] ss:$16 sps:$4 sm:$0xff]  }
  0x57   : > { %1184 = vsyncadd (%p1471_p1), [#allocation6], 4294959104  ;;  %625 = vmatprep.subr.bf16.mxu0 %v976_v0  ;;  %v981_v3 = vld [vmem:[#allocation5 + $0x8] ss:$16 sps:$4 sm:$0xff]   ;;  %668 = vmatprep.subr.bf16.mxu1 %v978_v1  ;;  %v982_v4 = vld [vmem:[#allocation5 + $0x24] ss:$16 sps:$4 sm:$0xff]  }
  0x58   : > { %626 = vmatpush1.bf16.msra.mxu0 %v980_v2  ;;  %669 = vmatpush1.bf16.msra.mxu1 %v981_v3  ;;  %v984_v5 = vld [vmem:[#allocation5 + $0x2c] ss:$16 sps:$4 sm:$0xff]   ;;  %v986_v6 = vld [vmem:[#allocation5 + $0x20] ss:$16 sps:$4 sm:$0xff]   ;;  %v987_v7 = vld [vmem:[#allocation5 + $0x28] ss:$16 sps:$4 sm:$0xff]   ;;  %v275_v2 = vlaneseq }
  0x59   : > { %627 = vmatprep.subr.bf16.mxu0 %v982_v4  ;;  %670 = vmatprep.subr.bf16.mxu1 %v984_v5  ;;  %v988_v8 = vld [vmem:[#allocation5 + $0x44] ss:$16 sps:$4 sm:$0xff]   ;;  %v990_v9 = vld [vmem:[#allocation5 + $0x4c] ss:$16 sps:$4 sm:$0xff]   ;;  %v992_v10 = vld [vmem:[#allocation5 + $0x40] ss:$16 sps:$4 sm:$0xff]  }
  0x5a   : > { %v993_v11 = vld [vmem:[#allocation5 + $0x48] ss:$16 sps:$4 sm:$0xff]   ;;  %v994_v12 = vld [vmem:[#allocation5 + $0x64] ss:$16 sps:$4 sm:$0xff]   ;;  %v996_v13 = vld [vmem:[#allocation5 + $0x6c] ss:$16 sps:$4 sm:$0xff]  }
  0x5b   : > { %v998_v14 = vld [vmem:[#allocation5 + $0x60] ss:$16 sps:$4 sm:$0xff]   ;;  %v999_v15 = vld [vmem:[#allocation5 + $0x68] ss:$16 sps:$4 sm:$0xff]   ;;  %v1000_v16 = vld [vmem:[#allocation5 + $0x84] ss:$16 sps:$4 sm:$0xff]  }
  0x5c   : > { %628 = vmatpush1.bf16.msra.mxu0 %v986_v6  ;;  %671 = vmatpush1.bf16.msra.mxu1 %v987_v7  ;;  %v1002_v17 = vld [vmem:[#allocation5 + $0x8c] ss:$16 sps:$4 sm:$0xff]   ;;  %v1004_v18 = vld [vmem:[#allocation5 + $0x80] ss:$16 sps:$4 sm:$0xff]   ;;  %v1005_v19 = vld [vmem:[#allocation5 + $0x88] ss:$16 sps:$4 sm:$0xff]  }
  0x5d   : > { %629 = vmatprep.subr.bf16.mxu0 %v988_v8  ;;  %672 = vmatprep.subr.bf16.mxu1 %v990_v9  ;;  %v1006_v20 = vld [vmem:[#allocation5 + $0xa4] ss:$16 sps:$4 sm:$0xff]   ;;  %v1008_v21 = vld [vmem:[#allocation5 + $0xac] ss:$16 sps:$4 sm:$0xff]   ;;  %v1010_v22 = vld [vmem:[#allocation5 + $0xa0] ss:$16 sps:$4 sm:$0xff]  }
  0x5e   : > { %v1011_v23 = vld [vmem:[#allocation5 + $0xa8] ss:$16 sps:$4 sm:$0xff]   ;;  %v1012_v24 = vld [vmem:[#allocation5 + $0xc4] ss:$16 sps:$4 sm:$0xff]   ;;  %v1014_v25 = vld [vmem:[#allocation5 + $0xcc] ss:$16 sps:$4 sm:$0xff]  }
  0x5f   : > { %v1016_v26 = vld [vmem:[#allocation5 + $0xc0] ss:$16 sps:$4 sm:$0xff]   ;;  %v1017_v27 = vld [vmem:[#allocation5 + $0xc8] ss:$16 sps:$4 sm:$0xff]   ;;  %v1018_v28 = vld [vmem:[#allocation5 + $0xe4] ss:$16 sps:$4 sm:$0xff]  }
  0x60   : > { %630 = vmatpush1.bf16.msra.mxu0 %v992_v10  ;;  %673 = vmatpush1.bf16.msra.mxu1 %v993_v11  ;;  %v1020_v29 = vld [vmem:[#allocation5 + $0xec] ss:$16 sps:$4 sm:$0xff]   ;;  %v1022_v30 = vld [vmem:[#allocation5 + $0xe0] ss:$16 sps:$4 sm:$0xff]   ;;  %v1023_v31 = vld [vmem:[#allocation5 + $0xe8] ss:$16 sps:$4 sm:$0xff]  }
  0x61   : > { %631 = vmatprep.subr.bf16.mxu0 %v994_v12  ;;  %674 = vmatprep.subr.bf16.mxu1 %v996_v13  ;;  %v1024_v32 = vld [vmem:[#allocation5 + $0x104] ss:$16 sps:$4 sm:$0xff]   ;;  %v1026_v33 = vld [vmem:[#allocation5 + $0x10c] ss:$16 sps:$4 sm:$0xff]   ;;  %v1028_v34 = vld [vmem:[#allocation5 + $0x100] ss:$16 sps:$4 sm:$0xff]  }
  0x62   : > { %v1029_v35 = vld [vmem:[#allocation5 + $0x108] ss:$16 sps:$4 sm:$0xff]   ;;  %v1030_v36 = vld [vmem:[#allocation5 + $0x124] ss:$16 sps:$4 sm:$0xff]   ;;  %v1032_v37 = vld [vmem:[#allocation5 + $0x12c] ss:$16 sps:$4 sm:$0xff]  }
  0x63   : > { %v1034_v38 = vld [vmem:[#allocation5 + $0x120] ss:$16 sps:$4 sm:$0xff]   ;;  %v1035_v39 = vld [vmem:[#allocation5 + $0x128] ss:$16 sps:$4 sm:$0xff]   ;;  %v1036_v40 = vld [vmem:[#allocation5 + $0x144] ss:$16 sps:$4 sm:$0xff]  }
  0x64   : > { %632 = vmatpush1.bf16.msra.mxu0 %v998_v14  ;;  %675 = vmatpush1.bf16.msra.mxu1 %v999_v15  ;;  %v1038_v41 = vld [vmem:[#allocation5 + $0x14c] ss:$16 sps:$4 sm:$0xff]   ;;  %v1040_v42 = vld [vmem:[#allocation5 + $0x140] ss:$16 sps:$4 sm:$0xff]   ;;  %v1041_v43 = vld [vmem:[#allocation5 + $0x148] ss:$16 sps:$4 sm:$0xff]  }
  0x65   : > { %633 = vmatprep.subr.bf16.mxu0 %v1000_v16  ;;  %676 = vmatprep.subr.bf16.mxu1 %v1002_v17  ;;  %v1042_v44 = vld [vmem:[#allocation5 + $0x164] ss:$16 sps:$4 sm:$0xff]   ;;  %v1044_v45 = vld [vmem:[#allocation5 + $0x16c] ss:$16 sps:$4 sm:$0xff]   ;;  %v1046_v47 = vld [vmem:[#allocation5 + $0x160] ss:$16 sps:$4 sm:$0xff]  }
  0x66   : > { %v1074_v46 = vld [vmem:[%s1377_s9 + $0x4] ss:$8 sps:$4 sm:$0xff]   ;;  %v1047_v48 = vld [vmem:[#allocation5 + $0x168] ss:$16 sps:$4 sm:$0xff]   ;;  %v1052_v51 = vld [vmem:[#allocation5 + $0x180] ss:$16 sps:$4 sm:$0xff]  }
  0x67   : > { %v1048_v49 = vld [vmem:[#allocation5 + $0x184] ss:$16 sps:$4 sm:$0xff]   ;;  %v1050_v50 = vld [vmem:[#allocation5 + $0x18c] ss:$16 sps:$4 sm:$0xff]   ;;  %657 = vmatprep.mubr.bf16.mxu0 %v1074_v46  ;;  %700 = vmatprep.mubr.bf16.mxu1 %v1074_v46  ;;  %v1053_v52 = vld [vmem:[#allocation5 + $0x188] ss:$16 sps:$4 sm:$0xff]  }
  0x68   : > { %634 = vmatpush1.bf16.msra.mxu0 %v1004_v18  ;;  %677 = vmatpush1.bf16.msra.mxu1 %v1005_v19  ;;  %v1054_v53 = vld [vmem:[#allocation5 + $0x1a4] ss:$16 sps:$4 sm:$0xff]   ;;  %v1056_v54 = vld [vmem:[#allocation5 + $0x1ac] ss:$16 sps:$4 sm:$0xff]   ;;  %v1058_v55 = vld [vmem:[#allocation5 + $0x1a0] ss:$16 sps:$4 sm:$0xff]  }
  0x69   : > { %635 = vmatprep.subr.bf16.mxu0 %v1006_v20  ;;  %678 = vmatprep.subr.bf16.mxu1 %v1008_v21  ;;  %v1059_v56 = vld [vmem:[#allocation5 + $0x1a8] ss:$16 sps:$4 sm:$0xff]   ;;  %v1060_v57 = vld [vmem:[#allocation5 + $0x1c4] ss:$16 sps:$4 sm:$0xff]   ;;  %v1062_v58 = vld [vmem:[#allocation5 + $0x1cc] ss:$16 sps:$4 sm:$0xff]  }
  0x6a   : > { %v1064_v59 = vld [vmem:[#allocation5 + $0x1c0] ss:$16 sps:$4 sm:$0xff]   ;;  %v1065_v60 = vld [vmem:[#allocation5 + $0x1c8] ss:$16 sps:$4 sm:$0xff]   ;;  %v1066_v61 = vld [vmem:[#allocation5 + $0x1e4] ss:$16 sps:$4 sm:$0xff]  }
  0x6b   : > { %v1068_v62 = vld [vmem:[#allocation5 + $0x1ec] ss:$16 sps:$4 sm:$0xff]   ;;  %v1070_v63 = vld [vmem:[#allocation5 + $0x1e0] ss:$16 sps:$4 sm:$0xff]   ;;  %v1071_v0 = vld [vmem:[#allocation5 + $0x1e8] ss:$16 sps:$4 sm:$0xff]  }
  0x6c   : > { %636 = vmatpush1.bf16.msra.mxu0 %v1010_v22  ;;  %679 = vmatpush1.bf16.msra.mxu1 %v1011_v23  ;;  %v1072_v1 = vld [vmem:[%s1377_s9] ss:$8 sps:$4 sm:$0xff]   ;;  %v276_v3 = vshrl.u32 %v275_v2, 7  ;;  %s836_s4 = sshll.u32 %s1373_s6, 6  ;;  %s912_s5 = sshll.u32 %s1255_s16, 10 }
  0x6d   : > { %637 = vmatprep.subr.bf16.mxu0 %v1012_v24  ;;  %680 = vmatprep.subr.bf16.mxu1 %v1014_v25  ;;  %v273_v6 = vld [vmem:[%s1456_s2] sm:$0xf]  ;;  %s1393_s25 = scalar_lea.vmem [#allocation7], %s836_s4  ;;  %s1404_s11 = scalar_lea.hbm %s1457_s3, %s912_s5 }
  0x6e   : > { %v277_v4 = vsub.s32 0, %v276_v3  ;;  %v285_v5 = vsub.s32 2, %v276_v3  ;;  %v281_v7 = vsub.s32 1, %v276_v3  ;;  %v289_v8 = vsub.s32 3, %v276_v3  ;;  %s742_s26 = sshll.u32 %s1393_s25, 4  ;;  %s728_s27 = scalar_lea.sflag [#allocation4], %s1373_s6  ;;  %s1397_s26 = int_to_ptr.vmem [resolvable:$true] %s742_s26 }
  0x6f   : > { %s1133_s28 = scalar_lea.vmem %s1397_s26, 1024  ;;  %s1211_s29 = smov [#allocation7]  }
  0x70   : > { %638 = vmatpush1.bf16.msra.mxu0 %v1016_v26  ;;  %681 = vmatpush1.bf16.msra.mxu1 %v1017_v27  ;;  %v278_v9 = vrot.slane %v273_v6, %v277_v4  ;;  %v286_v10 = vrot.slane %v273_v6, %v285_v5  ;;  %v282_v11 = vrot.slane %v273_v6, %v281_v7  ;;  %p1134_p4 = scmp.ne.s32.totalorder %s1397_s26, %s1133_s28  ;;  %s1137_s23 = sshll.u32 %s1211_s29, 4  ;;  %s1138_s23 = int_to_ptr.vmem [resolvable:$false] %s1137_s23 }
  0x71   : > { %639 = vmatprep.subr.bf16.mxu0 %v1018_v28  ;;  %682 = vmatprep.subr.bf16.mxu1 %v1020_v29  ;;  %v290_v12 = vrot.slane %v273_v6, %v289_v8  ;;  %s1139_s30 = scalar_lea.vmem %s1138_s23, 2048  ;;  %p1140_p10 = scmp.lt.s32.totalorder %s1397_s26, %s1138_s23 }
  0x72   : > { %p1135_p6 = pnand %p1134_p4, %p1325_p12  ;;  %p1141_p13 = scmp.lt.s32.totalorder %s1139_s30, %s1133_s28 }
  0x74   : > { %640 = vmatpush1.bf16.msra.mxu0 %v1022_v30  ;;  %683 = vmatpush1.bf16.msra.mxu1 %v1023_v31  ;;  %p1136_p8 = pneg %p1135_p6  ;;  %p1142_p3 = por %p1141_p13, %p1140_p10 }
  0x75   : > { %641 = vmatprep.subr.bf16.mxu0 %v1024_v32  ;;  %684 = vmatprep.subr.bf16.mxu1 %v1026_v33 }
  0x76   : > { %p1143_p7 = pnand %p1142_p3, %p1136_p8 }
  0x78   : > { %642 = vmatpush1.bf16.msra.mxu0 %v1028_v34  ;;  %685 = vmatpush1.bf16.msra.mxu1 %v1029_v35 }
  0x79   : > { %643 = vmatprep.subr.bf16.mxu0 %v1030_v36  ;;  %686 = vmatprep.subr.bf16.mxu1 %v1032_v37 }
  0x7c   : > { %644 = vmatpush1.bf16.msra.mxu0 %v1034_v38  ;;  %687 = vmatpush1.bf16.msra.mxu1 %v1035_v39 }
  0x7d   : > { %645 = vmatprep.subr.bf16.mxu0 %v1036_v40  ;;  %688 = vmatprep.subr.bf16.mxu1 %v1038_v41 }
  0x80   : > { %646 = vmatpush1.bf16.msra.mxu0 %v1040_v42  ;;  %689 = vmatpush1.bf16.msra.mxu1 %v1041_v43 }
  0x81   : > { %647 = vmatprep.subr.bf16.mxu0 %v1042_v44  ;;  %690 = vmatprep.subr.bf16.mxu1 %v1044_v45 }
  0x84   : > { %648 = vmatpush1.bf16.msra.mxu0 %v1046_v47  ;;  %691 = vmatpush1.bf16.msra.mxu1 %v1047_v48 }
  0x85   : > { %649 = vmatprep.subr.bf16.mxu0 %v1048_v49  ;;  %692 = vmatprep.subr.bf16.mxu1 %v1050_v50 }
  0x88   : > { %650 = vmatpush1.bf16.msra.mxu0 %v1052_v51  ;;  %693 = vmatpush1.bf16.msra.mxu1 %v1053_v52 }
  0x89   : > { %651 = vmatprep.subr.bf16.mxu0 %v1054_v53  ;;  %694 = vmatprep.subr.bf16.mxu1 %v1056_v54 }
  0x8c   : > { %652 = vmatpush1.bf16.msra.mxu0 %v1058_v55  ;;  %695 = vmatpush1.bf16.msra.mxu1 %v1059_v56 }
  0x8d   : > { %653 = vmatprep.subr.bf16.mxu0 %v1060_v57  ;;  %696 = vmatprep.subr.bf16.mxu1 %v1062_v58 }
  0x90   : > { %654 = vmatpush1.bf16.msra.mxu0 %v1064_v59  ;;  %697 = vmatpush1.bf16.msra.mxu1 %v1065_v60 }
  0x91   : > { %655 = vmatprep.subr.bf16.mxu0 %v1066_v61  ;;  %698 = vmatprep.subr.bf16.mxu1 %v1068_v62 }
  0x94   : > { %656 = vmatpush1.bf16.msra.mxu0 %v1070_v63  ;;  %699 = vmatpush1.bf16.msra.mxu1 %v1071_v0 }
  0x97   : > { %658 = vmatmul.mubr.bf16.vlgmr.msra.gmra.mrb[0].mxu0 %v1072_v1  ;;  %701 = vmatmul.mubr.bf16.vlgmr.msra.gmra.mrb[0].mxu1 %v1072_v1 }
 0x16a   : > { %v659_v13 = vpop.f32.mrb[0].mxu0  ;;  %v702_v14 = vpop.f32.mrb[0].mxu1 }
 0x16b   : > { %v660_v15 = vadd.f32 %v659_v13, %v278_v9  ;;  %v703_v16 = vadd.f32 %v702_v14, %v286_v10  ;;  %v661_v17 = vpop.f32.mrb[1].mxu0  ;;  %v704_v18 = vpop.f32.mrb[1].mxu1 }
 0x16c   : > { %v662_v19 = vadd.f32 %v661_v17, %v282_v11  ;;  %v705_v20 = vadd.f32 %v704_v18, %v290_v12  ;;  %v663_v21 = vpop.f32.mrb[2].mxu0  ;;  %v706_v22 = vpop.f32.mrb[2].mxu1 }
 0x16d   : > { %v711_v23 = vmax.f32 %v660_v15, 0.0  ;;  %v713_v24 = vmax.f32 %v703_v16, 0.0  ;;  %v664_v25 = vadd.f32 %v663_v21, %v278_v9  ;;  %v707_v26 = vadd.f32 %v706_v22, %v286_v10  ;;  %v665_v27 = vpop.f32.mrb[3].mxu0  ;;  %v708_v28 = vpop.f32.mrb[3].mxu1 }
 0x16e   : > { %v712_v29 = vmax.f32 %v662_v19, 0.0  ;;  %v714_v30 = vmax.f32 %v705_v20, 0.0  ;;  %v666_v31 = vadd.f32 %v665_v27, %v282_v11  ;;  %v709_v32 = vadd.f32 %v708_v28, %v290_v12 }
 0x16f   : > { %719 = vst [vmem:[%s1393_s25] sm:$0xff] %v711_v23  ;;  %721 = vst [vmem:[%s1393_s25 + $0x10] sm:$0xff] %v713_v24  ;;  %v715_v33 = vmax.f32 %v664_v25, 0.0  ;;  %v717_v34 = vmax.f32 %v707_v26, 0.0 }
 0x170   : > { %720 = vst [vmem:[%s1393_s25 + $0x8] sm:$0xff] %v712_v29  ;;  %722 = vst [vmem:[%s1393_s25 + $0x18] sm:$0xff] %v714_v30  ;;  %v716_v35 = vmax.f32 %v666_v31, 0.0  ;;  %v718_v36 = vmax.f32 %v709_v32, 0.0 }
 0x171   : > { %723 = vst [vmem:[%s1393_s25 + $0x20] sm:$0xff] %v715_v33  ;;  %725 = vst [vmem:[%s1393_s25 + $0x30] sm:$0xff] %v717_v34 }
 0x172   : > { %724 = vst [vmem:[%s1393_s25 + $0x28] sm:$0xff] %v716_v35  ;;  %726 = vst [vmem:[%s1393_s25 + $0x38] sm:$0xff] %v718_v36 }
 0x173   : > { %1146 = shalt.err (!%p1143_p7)
}
 0x174   : > { %s1147_s22 = scalar_lea.hbm %s1404_s11, 1024  ;;  %s1151_s9 = scalar_lea.hbm %s1457_s3, 2048 }
 0x175   : > { %p1148_p9 = scmp.ne.s32.totalorder %s1404_s11, %s1147_s22  ;;  %p1152_p5 = scmp.lt.u32.totalorder %s1404_s11, %s1457_s3 }
 0x176   : > { %p1153_p11 = scmp.lt.u32.totalorder %s1151_s9, %s1147_s22  ;;  %p1155_p4 = scmp.lt.u32.totalorder %s1147_s22, %s1404_s11 }
 0x177   : > { %p1149_p2 = pnand %p1148_p9, %p1325_p12 }
 0x178   : > { %p1154_p1 = por %p1153_p11, %p1152_p5 }
 0x179   : > { %p1150_p0 = pneg %p1149_p2 }
 0x17a   : > { %p1156_p6 = por %p1155_p4, %p1154_p1 }
 0x17c   : > { %p1157_p8 = pnand %p1156_p6, %p1150_p0 }
 0x17e   : > { %1160 = shalt.err (!%p1157_p8)
}
 0x17f   : > { %s1212_s4 = smov 512   ;;  %s1213_s25 = smov 32  }
 0x180   : > { %919 = dma.vmem_to_hbm [thread:$0]  (%p1325_p12), %s1397_s26, 1024, %s1404_s11, %s728_s27, %s1212_s4, %s1212_s4, %s1213_s25  }
 0x181 PF: > { %s757_s5 = sand.u32 1, %s1191_s12   ;;  %p1472_p10 = scmp.ne.s32.totalorder %s1462_s19, 0 }
 0x182   : > { %p1473_p13 = scmp.ge.s32.totalorder %s1203_s15, 2  ;;  %s758_s16 = scalar_lea.sflag [#allocation4], %s757_s5 }
 0x184   : > { %p930_p3 = pnand %p1473_p13, %p1472_p10 }
 0x186   : > { %1186 = dma.done.wait (!%p930_p3), %s758_s16, 1024  }
 0x187   : > { %1188 = vsyncadd (!%p930_p3), %s758_s16, 4294966272  ;;  %p17_p7 = scmp.ge.s32.totalorder %s1290_s24, 4   ;;  %s1474_s12 = smov %s1195_s13 }
 0x188   : > { %s1475_s13 = smov %s1199_s14  ;;  %s1476_s14 = smov %s1321_s17 }
 0x189   : > { %s1477_s15 = smov %s1290_s24  ;;  %19 = sbr.rel (!%p17_p7) target bundleno = 6 (0x6), region = 81 }
 0x190   :  { %763 = vsyncpa [#allocation3], 1 }
 0x191   :  { %765 = vsyncpa [#allocation3 + $0x1], 1 }
 0x192   :  { %766 = vsyncpa [#allocation6], 1 }
 0x193   :  { %767 = vsyncpa [#allocation4], 1 }
 0x194   :  { %769 = vsyncpa [#allocation4 + $0x1], 1 }

</bundles_post_ra>
